<compile_context>
chip_gen: v6e
topology: v6e:2x2x1
jax: 0.10.0
libtpu: 0.0.40
codegen_flags: <defaults>
</compile_context>

<pallas_src>
import functools

import jax
import jax.numpy as jnp
from jax.experimental import pallas as pl
from jax.experimental.pallas import tpu as pltpu


def _nonlocal_kernel(xq_ref, phi_ref, g_ref,
                     wth_ref, bth_ref,
                     wwf_ref, wsh_ref,
                     o_ref,
                     theta_ref, acc_ref,
                     *, mm_dtype):
    ki = pl.program_id(2)

    @pl.when(ki == 0)
    def _init():
        acc_ref[...] = jnp.zeros_like(acc_ref)
        # theta depends only on (bi, qi): compute once per query tile, keep it
        # resident in VMEM already cast to the matmul dtype (1/N pre-folded
        # into wth/bth in the wrapper).
        x_q = xq_ref[0]                                        # (C, TQ)
        th = (jnp.dot(wth_ref[...], x_q,
                      preferred_element_type=jnp.float32)
              + bth_ref[...])                                  # (IC, TQ)
        theta_ref[...] = th.astype(theta_ref.dtype)

    phi = phi_ref[0]                                           # (IC, TK)
    g = g_ref[0]                                               # (IC, TK)

    # Affinity tile oriented (TK, TQ): contract the sublane (IC) axis of both
    # operands, so the second matmul below is a canonical (IC,TK) @ (TK,TQ)
    # (no per-step relayout of the big tile).
    f = jax.lax.dot_general(
        phi, theta_ref[...],
        dimension_numbers=(((0,), (0,)), ((), ())),
        preferred_element_type=jnp.float32)                    # (TK, TQ)

    # NOTE: f is re-rounded to mm_dtype (bf16 by default) before the second
    # matmul for MXU throughput; use matmul_dtype=float32 for tight accuracy.
    acc_ref[...] += jnp.dot(g, f.astype(mm_dtype),
                            preferred_element_type=jnp.float32)  # (IC, TQ)

    @pl.when(ki == pl.num_programs(2) - 1)
    def _finalize():
        # W conv (eval-mode BN scale folded into the weight), one per-channel
        # shift, residual add.  Last dim = TQ -> lane-dense, unmasked stores.
        w_y = (jnp.dot(wwf_ref[...], acc_ref[...],
                       preferred_element_type=jnp.float32)
               + wsh_ref[...])                                 # (C, TQ)
        o_ref[0] = (w_y + xq_ref[0]).astype(o_ref.dtype)


def _pick_tile(n):
    # Prefer BIG tiles: key tiles are re-streamed once per query tile (DMA
    # traffic ~ 1/TQ) and big tiles amortize the ~0.35us per-step overhead.
    # A 512x512 f32 affinity tile is only 1 MiB, safe on every generation.
    for t in (512, 256, 128):
        if n % t == 0:
            return t
    return n


def non_local_pallas(x_nchw, params, *, tq=None, tk=None,
                     matmul_dtype=jnp.bfloat16):
    """x_nchw: (B, C, H, W) float32. Returns (B, C, H, W) float32."""
    b, c, h, w = x_nchw.shape
    n = h * w
    ic = params["wg"].shape[0]

    # Fold eval-mode BatchNorm2d into the W conv: per-channel scale goes into
    # the weight; everything additive collapses into one per-channel shift.
    # TODO(synk): train-mode BatchNorm (batch-statistics update) is not
    # implemented; this kernel uses running stats (inference semantics).
    inv_std = jax.lax.rsqrt(params["rvar"] + 1e-5)              # (C, 1)
    s = params["gamma"] * inv_std                               # (C, 1)
    ww_f = params["ww"] * s                                     # (C, IC)
    w_shift = (params["bw"] - params["rmean"]) * s + params["beta"]  # (C, 1)

    # Fold the 1/N scale (true N, pre-padding) into the theta conv.
    wth_s = params["wth"] * (1.0 / n)                           # (IC, C)
    bth_s = params["bth"] * (1.0 / n)                           # (IC, 1)

    x_bcn = x_nchw.reshape(b, c, n)          # NCHW -> (B, C, N): free reshape

    # Key-side 1x1 convs precomputed ONCE per call (instead of per query tile
    # inside the kernel), then emitted in the matmul dtype.
    phi = jnp.einsum("oc,bcn->bon", params["wph"], x_bcn) + params["bph"]
    g_x = jnp.einsum("oc,bcn->bon", params["wg"], x_bcn) + params["bg"]

    # Pad N up to a multiple of 128 (BlockSpec lane constraint).  phi/g are
    # padded with exact zeros AFTER the bias add, so padded key columns yield
    # f == 0 and contribute nothing; padded query columns are sliced off.
    n_pad = -(-n // 128) * 128
    pad = n_pad - n
    if pad:
        x_bcn = jnp.pad(x_bcn, ((0, 0), (0, 0), (0, pad)))
        phi = jnp.pad(phi, ((0, 0), (0, 0), (0, pad)))
        g_x = jnp.pad(g_x, ((0, 0), (0, 0), (0, pad)))
    phi = phi.astype(matmul_dtype)
    g_x = g_x.astype(matmul_dtype)

    auto_tq = tq is None
    tq = tq or _pick_tile(n_pad)
    tk = tk or _pick_tile(n_pad)
    if auto_tq:
        # Keep at least 2 parallel grid blocks so both v7x TensorCores get work.
        while (b * (n_pad // tq) < 2 and tq > 128
               and tq % 2 == 0 and n_pad % (tq // 2) == 0):
            tq //= 2
    assert n_pad % tq == 0 and n_pad % tk == 0

    # Explicit VMEM budget (double-buffered inputs/outputs + scratch + f tile)
    # so large tiles don't silently collapse pipelining, esp. on v7x (64 MiB).
    isz = jnp.dtype(matmul_dtype).itemsize
    vmem_est = (2 * c * tq * 4                      # x query tiles
                + 2 * 2 * ic * tk * isz             # phi + g key tiles
                + 2 * c * tq * 4                     # output tiles
                + 4 * (ic * c + c * ic + ic + c) * 4  # constant operands
                + ic * tq * (4 + isz)                # acc + theta scratch
                + tq * tk * 4)                       # f tile
    vmem_limit = max(32 << 20, min(int(vmem_est * 2) + (4 << 20), 64 << 20))

    const2d = lambda shape: pl.BlockSpec(shape, lambda bi, qi, ki: (0, 0))

    kernel = functools.partial(_nonlocal_kernel, mm_dtype=matmul_dtype)

    out = pl.pallas_call(
        kernel,
        out_shape=jax.ShapeDtypeStruct((b, c, n_pad), jnp.float32),
        grid_spec=pltpu.PrefetchScalarGridSpec(
            num_scalar_prefetch=0,
            grid=(b, n_pad // tq, n_pad // tk),
            in_specs=[
                pl.BlockSpec((1, c, tq), lambda bi, qi, ki: (bi, 0, qi)),   # x (query)
                pl.BlockSpec((1, ic, tk), lambda bi, qi, ki: (bi, 0, ki)),  # phi (key)
                pl.BlockSpec((1, ic, tk), lambda bi, qi, ki: (bi, 0, ki)),  # g (key)
                const2d((ic, c)), const2d((ic, 1)),    # theta conv (1/N folded)
                const2d((c, ic)), const2d((c, 1)),     # W conv (BN folded) + shift
            ],
            out_specs=pl.BlockSpec((1, c, tq), lambda bi, qi, ki: (bi, 0, qi)),
            scratch_shapes=[pltpu.VMEM((ic, tq), matmul_dtype),   # theta
                            pltpu.VMEM((ic, tq), jnp.float32)],   # y accumulator
        ),
        compiler_params=pltpu.CompilerParams(
            dimension_semantics=("parallel", "parallel", "arbitrary"),
            vmem_limit_bytes=vmem_limit),
    )(x_bcn, phi, g_x, wth_s, bth_s, ww_f, w_shift)

    if pad:
        out = out[:, :, :n]
    return out.reshape(b, c, h, w)


def _reference(x_nchw, params):
    """Pure-JAX f32 reference of the PyTorch forward (unfused math)."""
    b, c, h, w = x_nchw.shape
    n = h * w
    x = x_nchw.reshape(b, c, n)                                        # (B, C, N)
    g_x = jnp.einsum("oc,bcn->bon", params["wg"], x) + params["bg"]    # (B, IC, N)
    th = jnp.einsum("oc,bcn->bon", params["wth"], x) + params["bth"]
    ph = jnp.einsum("oc,bcn->bon", params["wph"], x) + params["bph"]
    f = jnp.einsum("bcq,bck->bqk", th, ph) / n                         # (B, N, N)
    y = jnp.einsum("bqk,bck->bcq", f, g_x)                             # (B, IC, N)
    w_y = jnp.einsum("oc,bcn->bon", params["ww"], y) + params["bw"]    # (B, C, N)
    inv_std = jax.lax.rsqrt(params["rvar"] + 1e-5)
    w_y = (w_y - params["rmean"]) * inv_std * params["gamma"] + params["beta"]
    z = w_y + x
    return z.reshape(b, c, h, w)


def make_params(key, in_channels, reduc_ratio=2, nontrivial_bn=True):
    ic = in_channels // reduc_ratio
    ks = jax.random.split(key, 12)

    def conv_w(k, cout, cin):   # PyTorch Conv2d 1x1 weight (cout, cin)
        return jax.random.normal(k, (cout, cin), jnp.float32) * 0.1

    params = {
        "wg":  conv_w(ks[0], ic, in_channels),
        "bg":  jax.random.normal(ks[1], (ic, 1), jnp.float32) * 0.1,
        "wth": conv_w(ks[2], ic, in_channels),
        "bth": jax.random.normal(ks[3], (ic, 1), jnp.float32) * 0.1,
        "wph": conv_w(ks[4], ic, in_channels),
        "bph": jax.random.normal(ks[5], (ic, 1), jnp.float32) * 0.1,
        "ww":  conv_w(ks[6], in_channels, ic),
        "bw":  jax.random.normal(ks[7], (in_channels, 1), jnp.float32) * 0.1,
    }
    if nontrivial_bn:
        # Non-default BN params so the W-conv / BN / affinity path is actually
        # exercised numerically (module init sets gamma=beta=0, which would
        # annihilate W_y and hide bugs).
        params.update(
            gamma=jax.random.normal(ks[8], (in_channels, 1), jnp.float32),
            beta=jax.random.normal(ks[9], (in_channels, 1), jnp.float32),
            rmean=jax.random.normal(ks[10], (in_channels, 1), jnp.float32) * 0.1,
            rvar=jnp.abs(jax.random.normal(ks[11], (in_channels, 1),
                                           jnp.float32)) + 0.5,
        )
    else:
        # PyTorch module defaults: gamma = beta = 0, running mean 0 / var 1.
        params.update(
            gamma=jnp.zeros((in_channels, 1), jnp.float32),
            beta=jnp.zeros((in_channels, 1), jnp.float32),
            rmean=jnp.zeros((in_channels, 1), jnp.float32),
            rvar=jnp.ones((in_channels, 1), jnp.float32),
        )
    return params


if __name__ == "__main__":
    key = jax.random.PRNGKey(0)
    k_x, k_p, k_x2 = jax.random.split(key, 3)

    B, C, H, W = 2, 4, 16, 16
    x = jax.random.normal(k_x, (B, C, H, W), jnp.float32)

    # 1) full path, non-default BN stats, f32 matmuls -> tight tolerance
    params = make_params(k_p, in_channels=C, reduc_ratio=2, nontrivial_bn=True)
    z_ref = _reference(x, params)
    z = jax.block_until_ready(
        non_local_pallas(x, params, matmul_dtype=jnp.float32))
    assert z.shape == (B, C, H, W)
    assert jnp.allclose(z, z_ref, atol=1e-4, rtol=1e-4), "f32 mismatch vs reference"

    # 2) module-default init (BN gamma = beta = 0): PyTorch init semantics
    params0 = make_params(k_p, in_channels=C, reduc_ratio=2, nontrivial_bn=False)
    z0 = jax.block_until_ready(
        non_local_pallas(x, params0, matmul_dtype=jnp.float32))
    assert jnp.allclose(z0, _reference(x, params0), atol=1e-4, rtol=1e-4), \
        "default-init mismatch vs reference"

    # 3) default bf16 MXU path (f32 accumulation), looser tolerance
    z_bf16 = jax.block_until_ready(non_local_pallas(x, params))
    assert jnp.allclose(z_bf16, z_ref, atol=3e-2, rtol=3e-2), "bf16 mismatch"

    # 4) N not a multiple of 128 (padding + zero-masked key columns path)
    Hp, Wp = 10, 10                                    # N = 100 -> padded to 128
    xp = jax.random.normal(k_x2, (B, C, Hp, Wp), jnp.float32)
    zp_ref = _reference(xp, params)
    zp = jax.block_until_ready(
        non_local_pallas(xp, params, matmul_dtype=jnp.float32))
    assert zp.shape == (B, C, Hp, Wp)
    assert jnp.allclose(zp, zp_ref, atol=1e-4, rtol=1e-4), "padded-N f32 mismatch"
    zp_bf16 = jax.block_until_ready(non_local_pallas(xp, params))
    assert jnp.allclose(zp_bf16, zp_ref, atol=3e-2, rtol=3e-2), "padded-N bf16 mismatch"

    print("KERNEL_OK")
</pallas_src>

<mosaic_0001>
module attributes {stable_mosaic.version = 11 : i64} {
  func.func @_nonlocal_kernel(%arg0: i32, %arg1: i32, %arg2: i32, %arg3: memref<1x4x256xf32, #tpu.memory_space<vmem>>, %arg4: memref<1x2x256xf32, #tpu.memory_space<vmem>>, %arg5: memref<1x2x256xf32, #tpu.memory_space<vmem>>, %arg6: memref<2x4xf32, #tpu.memory_space<vmem>>, %arg7: memref<2x1xf32, #tpu.memory_space<vmem>>, %arg8: memref<4x2xf32, #tpu.memory_space<vmem>>, %arg9: memref<4x1xf32, #tpu.memory_space<vmem>>, %arg10: memref<1x4x256xf32, #tpu.memory_space<vmem>>, %arg11: memref<2x256xf32, #tpu.memory_space<vmem>>, %arg12: memref<2x256xf32, #tpu.memory_space<vmem>>) attributes {dimension_semantics = [#tpu.dimension_semantics<parallel>, #tpu.dimension_semantics<parallel>, #tpu.dimension_semantics<arbitrary>], iteration_bounds = array<i64: 2, 1, 1>, scalar_prefetch = 0 : i64, scratch_operands = 2 : i64, tpu.core_type = #tpu.core_type<tc>, window_params = [{transform_indices = @transform_0, window_bounds = array<i64: 1, 4, 256>}, {transform_indices = @transform_1, window_bounds = array<i64: 1, 2, 256>}, {transform_indices = @transform_2, window_bounds = array<i64: 1, 2, 256>}, {pipeline_mode = #tpu.pipeline_mode<synchronous>, transform_indices = @transform_3, window_bounds = array<i64: 2, 4>}, {pipeline_mode = #tpu.pipeline_mode<synchronous>, transform_indices = @transform_4, window_bounds = array<i64: 2, 1>}, {pipeline_mode = #tpu.pipeline_mode<synchronous>, transform_indices = @transform_5, window_bounds = array<i64: 4, 2>}, {pipeline_mode = #tpu.pipeline_mode<synchronous>, transform_indices = @transform_6, window_bounds = array<i64: 4, 1>}, {transform_indices = @transform_7, window_bounds = array<i64: 1, 4, 256>}]} {
    %c0_i32 = arith.constant 0 : i32
    %0 = arith.cmpi eq, %arg2, %c0_i32 : i32
    %1 = arith.extui %0 : i1 to i32
    %c0_i32_0 = arith.constant 0 : i32
    %2 = arith.cmpi ne, %1, %c0_i32_0 : i32
    scf.if %2 {
      %cst_15 = arith.constant 0.000000e+00 : f32
      %16 = vector.broadcast %cst_15 : f32 to vector<2x256xf32>
      %c0_16 = arith.constant 0 : index
      %c0_17 = arith.constant 0 : index
      %17 = vector.load %arg12[%c0_16, %c0_17] : memref<2x256xf32, #tpu.memory_space<vmem>>, vector<2x256xf32>
      tpu.vector_store %arg12[%c0_16, %c0_17], %16 {strides = array<i32>} : memref<2x256xf32, #tpu.memory_space<vmem>>, vector<2x256xf32>,
      %c0_18 = arith.constant 0 : index
      %c0_19 = arith.constant 0 : index
      %c0_20 = arith.constant 0 : index
      %18 = vector.load %arg3[%c0_18, %c0_19, %c0_20] : memref<1x4x256xf32, #tpu.memory_space<vmem>>, vector<1x4x256xf32>
      %19 = vector.shape_cast %18 : vector<1x4x256xf32> to vector<4x256xf32>
      %c0_21 = arith.constant 0 : index
      %c0_22 = arith.constant 0 : index
      %20 = vector.load %arg6[%c0_21, %c0_22] : memref<2x4xf32, #tpu.memory_space<vmem>>, vector<2x4xf32>
      %cst_23 = arith.constant dense<0.000000e+00> : vector<2x256xf32>
      %21 = tpu.matmul %20, %19, %cst_23 {dimension_numbers = #tpu.dot_dimension_numbers<[1], [0], [0], [1], [0, 0, 1, 1], [], []>} : vector<2x4xf32>, vector<4x256xf32>, vector<2x256xf32> -> vector<2x256xf32>
      %c0_24 = arith.constant 0 : index
      %c0_25 = arith.constant 0 : index
      %22 = vector.load %arg7[%c0_24, %c0_25] : memref<2x1xf32, #tpu.memory_space<vmem>>, vector<2x1xf32>
      %23 = vector.broadcast %22 : vector<2x1xf32> to vector<2x256xf32>
      %24 = arith.addf %21, %23 : vector<2x256xf32>
      %c0_26 = arith.constant 0 : index
      %c0_27 = arith.constant 0 : index
      %25 = vector.load %arg11[%c0_26, %c0_27] : memref<2x256xf32, #tpu.memory_space<vmem>>, vector<2x256xf32>
      tpu.vector_store %arg11[%c0_26, %c0_27], %24 {strides = array<i32>} : memref<2x256xf32, #tpu.memory_space<vmem>>, vector<2x256xf32>,
    } else {
    }
    %c0 = arith.constant 0 : index
    %c0_1 = arith.constant 0 : index
    %c0_2 = arith.constant 0 : index
    %3 = vector.load %arg4[%c0, %c0_1, %c0_2] : memref<1x2x256xf32, #tpu.memory_space<vmem>>, vector<1x2x256xf32>
    %4 = vector.shape_cast %3 : vector<1x2x256xf32> to vector<2x256xf32>
    %c0_3 = arith.constant 0 : index
    %c0_4 = arith.constant 0 : index
    %c0_5 = arith.constant 0 : index
    %5 = vector.load %arg5[%c0_3, %c0_4, %c0_5] : memref<1x2x256xf32, #tpu.memory_space<vmem>>, vector<1x2x256xf32>
    %6 = vector.shape_cast %5 : vector<1x2x256xf32> to vector<2x256xf32>
    %c0_6 = arith.constant 0 : index
    %c0_7 = arith.constant 0 : index
    %7 = vector.load %arg11[%c0_6, %c0_7] : memref<2x256xf32, #tpu.memory_space<vmem>>, vector<2x256xf32>
    %cst = arith.constant dense<0.000000e+00> : vector<256x256xf32>
    %8 = tpu.matmul %4, %7, %cst {dimension_numbers = #tpu.dot_dimension_numbers<[0], [0], [1], [1], [0, 1, 1, 1], [], []>} : vector<2x256xf32>, vector<2x256xf32>, vector<256x256xf32> -> vector<256x256xf32>
    %c0_8 = arith.constant 0 : index
    %c0_9 = arith.constant 0 : index
    %9 = vector.load %arg12[%c0_8, %c0_9] : memref<2x256xf32, #tpu.memory_space<vmem>>, vector<2x256xf32>
    %cst_10 = arith.constant dense<0.000000e+00> : vector<2x256xf32>
    %10 = tpu.matmul %6, %8, %cst_10 {dimension_numbers = #tpu.dot_dimension_numbers<[1], [0], [0], [1], [0, 0, 1, 1], [], []>} : vector<2x256xf32>, vector<256x256xf32>, vector<2x256xf32> -> vector<2x256xf32>
    %11 = arith.addf %9, %10 : vector<2x256xf32>
    %c0_11 = arith.constant 0 : index
    %c0_12 = arith.constant 0 : index
    %12 = vector.load %arg12[%c0_11, %c0_12] : memref<2x256xf32, #tpu.memory_space<vmem>>, vector<2x256xf32>
    tpu.vector_store %arg12[%c0_11, %c0_12], %11 {strides = array<i32>} : memref<2x256xf32, #tpu.memory_space<vmem>>, vector<2x256xf32>,
    %c0_i32_13 = arith.constant 0 : i32
    %13 = arith.cmpi eq, %arg2, %c0_i32_13 : i32
    %14 = arith.extui %13 : i1 to i32
    %c0_i32_14 = arith.constant 0 : i32
    %15 = arith.cmpi ne, %14, %c0_i32_14 : i32
    scf.if %15 {
      %c0_15 = arith.constant 0 : index
      %c0_16 = arith.constant 0 : index
      %16 = vector.load %arg8[%c0_15, %c0_16] : memref<4x2xf32, #tpu.memory_space<vmem>>, vector<4x2xf32>
      %c0_17 = arith.constant 0 : index
      %c0_18 = arith.constant 0 : index
      %17 = vector.load %arg12[%c0_17, %c0_18] : memref<2x256xf32, #tpu.memory_space<vmem>>, vector<2x256xf32>
      %cst_19 = arith.constant dense<0.000000e+00> : vector<4x256xf32>
      %18 = tpu.matmul %16, %17, %cst_19 {dimension_numbers = #tpu.dot_dimension_numbers<[1], [0], [0], [1], [0, 0, 1, 1], [], []>} : vector<4x2xf32>, vector<2x256xf32>, vector<4x256xf32> -> vector<4x256xf32>
      %c0_20 = arith.constant 0 : index
      %c0_21 = arith.constant 0 : index
      %19 = vector.load %arg9[%c0_20, %c0_21] : memref<4x1xf32, #tpu.memory_space<vmem>>, vector<4x1xf32>
      %20 = vector.broadcast %19 : vector<4x1xf32> to vector<4x256xf32>
      %21 = arith.addf %18, %20 : vector<4x256xf32>
      %c0_22 = arith.constant 0 : index
      %c0_23 = arith.constant 0 : index
      %c0_24 = arith.constant 0 : index
      %22 = vector.load %arg3[%c0_22, %c0_23, %c0_24] : memref<1x4x256xf32, #tpu.memory_space<vmem>>, vector<1x4x256xf32>
      %23 = vector.shape_cast %22 : vector<1x4x256xf32> to vector<4x256xf32>
      %24 = arith.addf %21, %23 : vector<4x256xf32>
      %c0_25 = arith.constant 0 : index
      %c0_26 = arith.constant 0 : index
      %c0_27 = arith.constant 0 : index
      %25 = vector.load %arg10[%c0_25, %c0_26, %c0_27] : memref<1x4x256xf32, #tpu.memory_space<vmem>>, vector<1x4x256xf32>
      %26 = vector.shape_cast %25 : vector<1x4x256xf32> to vector<4x256xf32>
      %27 = vector.shape_cast %24 : vector<4x256xf32> to vector<1x4x256xf32>
      tpu.vector_store %arg10[%c0_25, %c0_26, %c0_27], %27 {strides = array<i32>} : memref<1x4x256xf32, #tpu.memory_space<vmem>>, vector<1x4x256xf32>,
    } else {
    }
    return
  }
  func.func @transform_0(%arg0: i32, %arg1: i32, %arg2: i32) -> (i32, i32, i32) {
    %c0_i32 = arith.constant 0 : i32
    %c0_i32_0 = arith.constant 0 : i32
    return %arg0, %c0_i32, %arg1 : i32, i32, i32
  }
  func.func @transform_1(%arg0: i32, %arg1: i32, %arg2: i32) -> (i32, i32, i32) {
    %c0_i32 = arith.constant 0 : i32
    %c0_i32_0 = arith.constant 0 : i32
    return %arg0, %c0_i32, %arg2 : i32, i32, i32
  }
  func.func @transform_2(%arg0: i32, %arg1: i32, %arg2: i32) -> (i32, i32, i32) {
    %c0_i32 = arith.constant 0 : i32
    %c0_i32_0 = arith.constant 0 : i32
    return %arg0, %c0_i32, %arg2 : i32, i32, i32
  }
  func.func @transform_3(%arg0: i32, %arg1: i32, %arg2: i32) -> (i32, i32) {
    %c0_i32 = arith.constant 0 : i32
    %c0_i32_0 = arith.constant 0 : i32
    %c0_i32_1 = arith.constant 0 : i32
    return %c0_i32, %c0_i32_0 : i32, i32
  }
  func.func @transform_4(%arg0: i32, %arg1: i32, %arg2: i32) -> (i32, i32) {
    %c0_i32 = arith.constant 0 : i32
    %c0_i32_0 = arith.constant 0 : i32
    %c0_i32_1 = arith.constant 0 : i32
    return %c0_i32, %c0_i32_0 : i32, i32
  }
  func.func @transform_5(%arg0: i32, %arg1: i32, %arg2: i32) -> (i32, i32) {
    %c0_i32 = arith.constant 0 : i32
    %c0_i32_0 = arith.constant 0 : i32
    %c0_i32_1 = arith.constant 0 : i32
    return %c0_i32, %c0_i32_0 : i32, i32
  }
  func.func @transform_6(%arg0: i32, %arg1: i32, %arg2: i32) -> (i32, i32) {
    %c0_i32 = arith.constant 0 : i32
    %c0_i32_0 = arith.constant 0 : i32
    %c0_i32_1 = arith.constant 0 : i32
    return %c0_i32, %c0_i32_0 : i32, i32
  }
  func.func @transform_7(%arg0: i32, %arg1: i32, %arg2: i32) -> (i32, i32, i32) {
    %c0_i32 = arith.constant 0 : i32
    %c0_i32_0 = arith.constant 0 : i32
    return %arg0, %c0_i32, %arg1 : i32, i32, i32
  }
}

</mosaic_0001>

<bundles_post_ra>
// kernel: tpu_custom_call.1
= control target key start
LH: loop header
LB: loop body
LE: loop exit
PB: predicated region body
PF: predicated region fallthrough
CT: control target
= control target key end

     0   :  { %s1974_s0 = inlined_call_operand.hbm [shape: f32[2,4,256], index: 0, kind: input, shape index: {}]   ;;  %s1975_s1 = inlined_call_operand.vmem [shape: f32[2,2,256], index: 1, kind: input, shape index: {}]   ;;  %s1976_s2 = inlined_call_operand.vmem [shape: f32[2,2,256], index: 2, kind: input, shape index: {}]   ;;  %s1977_s3 = inlined_call_operand.hbm [shape: f32[2,4], index: 3, kind: input, shape index: {}]   ;;  %s1978_s4 = inlined_call_operand.vmem [shape: f32[2,1], index: 4, kind: input, shape index: {}]   ;;  %s1979_s5 = inlined_call_operand.vmem [shape: f32[4,2], index: 5, kind: input, shape index: {}]   ;;  %s1980_s6 = inlined_call_operand.vmem [shape: f32[4,1], index: 6, kind: input, shape index: {}]   ;;  %s1981_s7 = inlined_call_operand.hbm [shape: f32[2,4,256], index: 7, kind: output, shape index: {}]  }
   0x1   :  { %1985 = sst [smem:[#allocation15_spill]] %s1977_s3 }
   0x2   :  { %12 = vsyncpa [#allocation5], 0 }
   0x3   :  { %14 = vsyncpa [#allocation5 + $0x1], 0 }
   0x4   :  { %15 = vsyncpa [#allocation8], 0 }
   0x5   :  { %16 = vsyncpa [#allocation6], 0 }
   0x6   :  { %18 = vsyncpa [#allocation6 + $0x1], 0  ;;  %s1650_s24 = smov 0   ;;  %s1652_s25 = smov 0  }
   0x7   :  { %s1654_s26 = smov 0   ;;  %s1656_s27 = smov 0  }
   0x8   :  { %s1658_s28 = smov 0   ;;  %s1660_s29 = smov 0  }
   0x9 LB: > { %1986 = sst [smem:[#allocation13_spill]] %s1598_s28  ;;  %s1315_s30 = sadd.s32 4294967295, %s1602_s29   ;;  %s1602_s29 = sphi %s1660_s29, %s24_s29   ;;  %s1598_s28 = sphi %s1658_s28, %s2001_s28   ;;  %s1594_s27 = sphi %s1656_s27, %s2000_s27   ;;  %s1590_s26 = sphi %s1654_s26, %s2004_s26   ;;  %s1586_s25 = sphi %s1652_s25, %s2003_s25   ;;  %s1582_s24 = sphi %s1650_s24, %s2002_s24  }
   0xa   : > { %s1316_s8 = sadd.s32 4294967294, %s1602_s29   ;;  %p65_p0 = scmp.ne.s32.totalorder %s1586_s25, %s1582_s24 }
   0xb   : > { %p1684_p1 = scmp.eq.s32.totalorder %s1315_s30, 0  ;;  %p1688_p2 = scmp.eq.s32.totalorder %s1315_s30, 1 }
   0xc   : > { %p237_p3 = scmp.eq.s32.totalorder %s1316_s8, 1  ;;  %p1317_p5 = scmp.ge.s32.totalorder %s1602_s29, 1 }
   0xd   : > { %p1694_p4 = por %p1684_p1, %p65_p0  ;;  %p244_p7 = scmp.lt.s32.totalorder %s1602_s29, 3 }
   0xe   : > { %p1699_p6 = por %p237_p3, %p65_p0  ;;  %s1604_s14 = smov [#allocation7]  }
   0xf   : > { %s1989_s11 = scalar_select %p1694_p4, 1, 0 }
  0x10   : > { %s1990_s12 = scalar_select %p1699_p6, 1, 0 }
  0x11   : > { %p1704_p8 = pnand %p1317_p5, %p244_p7  ;;  %s257_s15 = sshll.u32 %s1604_s14, 4  ;;  %s258_s15 = int_to_ptr.vmem [resolvable:$true] %s257_s15 }
  0x12   : > { %s43_s17 = sadd.s32 1, %s1598_s28  ;;  %s52_s18 = sadd.s32 1, %s1590_s26 }
  0x13   : > { %p1393_p10 = pneg %p1704_p8  ;;  %p45_p12 = scmp.ge.s32.totalorder %s43_s17, 2 }
  0x14   : > { %s1475_s19 = scalar_lea.vmem %s258_s15, 32  ;;  %p1483_p7 = scmp.lt.s32.totalorder %s258_s15, %s258_s15 }
  0x15   : > { %p1713_p11 = pnand %p1393_p10, %p1684_p1  ;;  %p1476_p0 = scmp.ne.s32.totalorder %s258_s15, %s1475_s19 }
  0x16   : > { %p1484_p6 = scmp.lt.s32.totalorder %s1475_s19, %s1475_s19 }
  0x17   : > { %p1466_p13 = pneg %p1713_p11 }
  0x18   : > { %p1485_p9 = por %p1484_p6, %p1483_p7 }
  0x19   : > { %p1478_p3 = pnand %p1476_p0, %p1466_p13 }
  0x1b   : > { %p1479_p5 = pneg %p1478_p3 }
  0x1d   : > { %p1486_p4 = pnand %p1485_p9, %p1479_p5 }
  0x1f   : > { %1489 = shalt.err (!%p1486_p4)
}
  0x20   : > { %s1993_s3 = sld [smem:[#allocation15_spill]]  ;;  %s2006_s17 = smov (%p45_p12, %s43_s17), 0 }
  0x21   : > { %1994 = sst [smem:[#allocation14_spill]] %s2006_s17  ;;  %p59_p6 = scmp.ne.s32.totalorder %s1590_s26, %s1586_s25 }
  0x22   : > { %p60_p4 = scmp.eq.s32.totalorder %s1602_s29, 0  ;;  %s47_s22 = ssub.s32 %s1598_s28, %s2006_s17 }
  0x23   : > { %p1406_p9 = scmp.lt.s32.totalorder %s1602_s29, 2  ;;  %p50_p10 = scmp.eq.s32.totalorder %s47_s22, 0 }
  0x24   : > { %p61_p13 = por %p60_p4, %p59_p6  ;;  %p1736_p0 = por %p1688_p2, %p59_p6 }
  0x25   : > { %s277_s30 = sand.u32 1, %s1590_s26   ;;  %s1381_s16 = sshll.u32 %s1598_s28, 7 }
  0x26   : > { %1396 = dma.hbm_to_vmem [thread:$0]  (!%p1713_p11), %s1993_s3, 32, %s258_s15, [#allocation8]  }
  0x27   : > { %s1742_s8 = scalar_select %p50_p10, %s1590_s26, %s52_s18  }
  0x28   : > { %s1320_s14 = sshll.u32 %s277_s30, 3  ;;  %s289_s20 = scalar_lea.hbm %s1974_s0, %s1381_s16 }
  0x29   : > { %s281_s21 = scalar_lea.vmem [#allocation4], %s1320_s14  ;;  %p1748_p11 = pnand %p1406_p9, %p61_p13 }
  0x2a   : > { %s291_s3 = sshll.u32 %s281_s21, 4  ;;  %s278_s10 = scalar_lea.sflag [#allocation5], %s277_s30  ;;  %s292_s3 = int_to_ptr.vmem [resolvable:$true] %s291_s3 }
  0x2b   : > { %p1492_p2 = pneg %p1748_p11  ;;  %s1503_s17 = scalar_lea.vmem %s292_s3, 128 }
  0x2c   : > { %p1504_p12 = scmp.ne.s32.totalorder %s292_s3, %s1503_s17  ;;  %s1605_s18 = smov [#allocation4]  }
  0x2d   : > { %s1508_s28 = sshll.u32 %s1605_s18, 4  ;;  %s1509_s28 = int_to_ptr.vmem [resolvable:$false] %s1508_s28 }
  0x2e   : > { %p1506_p3 = pnand %p1504_p12, %p1492_p2  ;;  %s1510_s15 = scalar_lea.vmem %s1509_s28, 256 }
  0x2f   : > { %p1511_p7 = scmp.lt.s32.totalorder %s292_s3, %s1509_s28  ;;  %p1512_p6 = scmp.lt.s32.totalorder %s1510_s15, %s1503_s17 }
  0x30   : > { %p1507_p5 = pneg %p1506_p3 }
  0x31   : > { %p1513_p4 = por %p1512_p6, %p1511_p7 }
  0x33   : > { %p1514_p10 = pnand %p1513_p4, %p1507_p5 }
  0x35   : > { %1517 = shalt.err (!%p1514_p10)
}
  0x36   : > { %1400 = dma.hbm_to_vmem [thread:$0]  (!%p1748_p11), %s289_s20, 128, %s292_s3, %s278_s10  }
  0x37   : > { %326 = sbr.rel (%p1704_p8) target bundleno = 1057 (0x421), region = 48  ;;  %s1759_s30 = sand.u32 (!%p1704_p8), 1, %s1586_s25  }
  0x38   : > { %s1324_s14 = sshll.u32 (!%p1704_p8), %s1759_s30, 3  ;;  %s329_s16 = scalar_lea.sflag (!%p1704_p8), [#allocation5], %s1759_s30 }
  0x39   : > { %s332_s28 = scalar_lea.vmem (!%p1704_p8), [#allocation4], %s1324_s14  ;;  %p1997_p9 = scmp.ne.s32.totalorder (!%p1704_p8), %s1989_s11, 0 }
  0x3c   : > { %1569 = dma.done.wait (%p1997_p9), %s329_s16, 128  }
  0x3d   : > { %1571 = vsyncadd (%p1997_p9), %s329_s16, 4294967168 }
  0x3e   : > { %1573 = dma.done.wait (%p1684_p1), [#allocation8], 32  }
  0x3f   : > { %1575 = vsyncadd (%p1684_p1), [#allocation8], 4294967264  ;;  %v1606_v0 = vmov 0.0   ;;  %v1607_v1 = vmov 0   ;;  %p387_p8 = scmp.lt.s32.totalorder %s1594_s27, 1  ;;  %v1786_v2 = vld [vmem:[%s332_s28] sm:$0xff] }
  0x40   : > { %495 = vmatprep.mubr.f32.mxu0 %v1606_v0  ;;  %411 = vst [vmem:[#allocation3] sm:$0xf] %v1606_v0  ;;  %1461 = vset.pattern.permute.xlu0 %v1607_v1  ;;  %vm426_vm0 = vcmask 1043456   ;;  %v414_v3 = vld [vmem:[%s1978_s4] sm:$0x3]  ;;  %v1793_v4 = vcombine.high %v1786_v2, %v1786_v2  ;;  %vm422_vm1 = vcmask 31744  }
  0x41   : > { %767 = vmatprep.mubr.f32.mxu1 %v1606_v0  ;;  %s1778_s3 = scalar_select %p387_p8, %s1594_s27, 1  ;;  %417 = vperm.xlu0 %1461, %v414_v3   ;;  %v413_v6 = vld [vmem:[#allocation7] sm:$0x3]  ;;  %vm698_vm2 = vcmask 1041408   ;;  %vm601_vm3 = vcmask 15360  }
  0x42   : > { %1331 = vmatprep.subr.msk.mxu0 %vm426_vm0, %v1793_v4  ;;  %s1166_s20 = scalar_lea.sflag [#allocation6], %s1759_s30 }
  0x43   : > { %s1382_s11 = sshll.u32 %s1778_s3, 2  ;;  %1332 = vmatpush1.msk.msra.mxu0 %vm426_vm0, %v1786_v2  ;;  %s1384_s3 = sshll.u32 %s1594_s27, 7 }
  0x44   : > { %s394_s17 = scalar_lea.vmem %s1975_s1, %s1382_s11  ;;  %1333 = vmatmul.mubr.msk.f32.vlgmr.msra.gmra.mxu0 %vm422_vm1, %v413_v6  ;;  %s404_s10 = scalar_lea.vmem %s1976_s2, %s1382_s11 }
  0x45   : > { %v1335_v5 = vld.sshfl [vmem:[%s394_s17] sm:$0x33 pattern:$0x76325410]  ;;  %s384_s11 = scalar_lea.vmem [#allocation9], %s1324_s14  ;;  %s1180_s19 = scalar_lea.hbm %s1981_s7, %s1384_s3 }
  0x46   : > { %v525_v7 = vcombine.high %v1335_v5, %v1335_v5  ;;  %v1883_v62 = vld.sshfl [vmem:[%s404_s10] sm:$0x33 pattern:$0x76325410]  ;;  %s1182_s9 = sshll.u32 %s384_s11, 4  ;;  %s1609_s27 = smov [#allocation9]   ;;  %s1183_s9 = int_to_ptr.vmem [resolvable:$true] %s1182_s9 }
  0x47   : > { %s1518_s21 = scalar_lea.vmem %s1183_s9, 128  ;;  %s1522_s14 = sshll.u32 %s1609_s27, 4  ;;  %s1523_s14 = int_to_ptr.vmem [resolvable:$false] %s1522_s14 }
  0x48   : > { %560 = vxpose.xlu1.b32.start.end [1/1] (short) %v525_v7, 128  ;;  %p1519_p1 = scmp.ne.s32.totalorder %s1183_s9, %s1518_s21  ;;  %s1524_s22 = scalar_lea.vmem %s1523_s14, 256 }
  0x49   : > { %p1525_p2 = scmp.lt.s32.totalorder %s1183_s9, %s1523_s14  ;;  %p1526_p12 = scmp.lt.s32.totalorder %s1524_s22, %s1518_s21 }
  0x4a   : > { %p1520_p13 = pnand %p1519_p1, %p1736_p0 }
  0x4b   : > { %p1527_p3 = por %p1526_p12, %p1525_p2 }
  0x4c   : > { %p1521_p11 = pneg %p1520_p13 }
  0x4e   : > { %p1528_p5 = pnand %p1527_p3, %p1521_p11 }
  0x5f   : > { %528 = vxpose.xlu0.b32.start.end [1/1] (short) %v1335_v5, 128 }
  0x66   : > { %1462 = vset.pattern.permute.xlu1 %v1607_v1  ;;  %v969_v1 = vcombine.high %v1883_v62, %v1883_v62 }
  0x68   : > { %1036 = vmatprep.mubr.f32.mxu0 %v969_v1  ;;  %v960_v1 = vld [vmem:[#allocation3] sm:$0xf] }
  0xbc   : > { %v418_v8 = vpop.permute.xlu0 %417 }
  0xc4   : > { %v576_v27 = vpop.trf.xlu1 }
  0xc8   : > { %v577_v29 = vpop.trf.xlu1 }
  0xcc   : > { %v578_v31 = vpop.trf.xlu1 }
  0xd0   : > { %v579_v33 = vpop.trf.xlu1 }
  0xd4   : > { %v580_v35 = vpop.trf.xlu1 }
  0xd8   : > { %v581_v37 = vpop.trf.xlu1 }
  0xdb   : > { %v544_v9 = vpop.trf.xlu0 }
  0xdc   : > { %v582_v38 = vpop.trf.xlu1 }
  0xdf   : > { %v545_v10 = vpop.trf.xlu0 }
  0xe0   : > { %v583_v39 = vpop.trf.xlu1 }
  0xe3   : > { %v546_v11 = vpop.trf.xlu0 }
  0xe4   : > { %v584_v40 = vpop.trf.xlu1 }
  0xe7   : > { %v547_v16 = vpop.trf.xlu0 }
  0xe8   : > { %v585_v41 = vpop.trf.xlu1 }
  0xeb   : > { %v548_v18 = vpop.trf.xlu0 }
  0xec   : > { %v586_v42 = vpop.trf.xlu1 }
  0xef   : > { %v549_v21 = vpop.trf.xlu0 }
  0xf0   : > { %v587_v43 = vpop.trf.xlu1 }
  0xf3   : > { %v550_v22 = vpop.trf.xlu0 }
  0xf4   : > { %v588_v44 = vpop.trf.xlu1 }
  0xf7   : > { %v551_v23 = vpop.trf.xlu0 }
  0xf8   : > { %v589_v45 = vpop.trf.xlu1 }
  0xfb   : > { %v552_v24 = vpop.trf.xlu0 }
  0xfc   : > { %v590_v46 = vpop.trf.xlu1 }
  0xff   : > { %v553_v25 = vpop.trf.xlu0 }
 0x100   : > { %v591_v47 = vpop.trf.xlu1 }
 0x103   : > { %v554_v26 = vpop.trf.xlu0 }
 0x104   : > { %v497_v12 = vpop.f32.mrf.mxu0 }
 0x105   : > { %v498_v14 = vadd.f32 %v497_v12, %v418_v8 }
 0x106   : > { %v499_v13 = vpop.f32.mrf.mxu0 }
 0x107   : > { %v500_v15 = vadd.f32 %v499_v13, %v418_v8  ;;  %v555_v28 = vpop.trf.xlu0 }
 0x109   : > { %v504_v17 = vcombine.low %v498_v14, %v500_v15 }
 0x10b   : > { %1334 = vst.sshfl [vmem:[#allocation2] sm:$0x33 pattern:$0x76325410] %v504_v17  ;;  %v556_v30 = vpop.trf.xlu0 }
 0x10f   : > { %v557_v32 = vpop.trf.xlu0 }
 0x112   : > { %v1336_v19 = vld.sshfl [vmem:[#allocation2] sm:$0x33 pattern:$0x76325410] }
 0x113   : > { %v600_v20 = vcombine.high %v1336_v19, %v1336_v19  ;;  %v558_v34 = vpop.trf.xlu0 }
 0x115   : > { %1337 = vmatprep.subr.msk.mxu1 %vm698_vm2, %v600_v20 }
 0x116   : > { %1338 = vmatpush1.msk.msra.mxu1 %vm698_vm2, %v1336_v19 }
 0x117   : > { %1339 = vmatmul.mubr.msk.f32.vlgmr.msra.gmra.mxu1 %vm601_vm3, %v544_v9  ;;  %v559_v36 = vpop.trf.xlu0 }
 0x118   : > { %773 = vmatprep.mubr.f32.mxu1 %v1606_v0 }
 0x11b   : > { %1340 = vmatmul.mubr.msk.f32.gmra.mxu1 %vm601_vm3, %v545_v10 }
 0x11c   : > { %779 = vmatprep.mubr.f32.mxu1 %v1606_v0 }
 0x11f   : > { %1341 = vmatmul.mubr.msk.f32.gmra.mxu1 %vm601_vm3, %v546_v11 }
 0x120   : > { %785 = vmatprep.mubr.f32.mxu1 %v1606_v0 }
 0x123   : > { %1342 = vmatmul.mubr.msk.f32.gmra.mxu1 %vm601_vm3, %v547_v16 }
 0x124   : > { %791 = vmatprep.mubr.f32.mxu1 %v1606_v0 }
 0x127   : > { %1343 = vmatmul.mubr.msk.f32.gmra.mxu1 %vm601_vm3, %v548_v18 }
 0x128   : > { %797 = vmatprep.mubr.f32.mxu1 %v1606_v0 }
 0x12b   : > { %1344 = vmatmul.mubr.msk.f32.gmra.mxu1 %vm601_vm3, %v549_v21 }
 0x12c   : > { %803 = vmatprep.mubr.f32.mxu1 %v1606_v0 }
 0x12f   : > { %1345 = vmatmul.mubr.msk.f32.gmra.mxu1 %vm601_vm3, %v550_v22 }
 0x130   : > { %809 = vmatprep.mubr.f32.mxu1 %v1606_v0 }
 0x133   : > { %1346 = vmatmul.mubr.msk.f32.gmra.mxu1 %vm601_vm3, %v551_v23 }
 0x134   : > { %815 = vmatprep.mubr.f32.mxu1 %v1606_v0 }
 0x137   : > { %1347 = vmatmul.mubr.msk.f32.gmra.mxu1 %vm601_vm3, %v552_v24 }
 0x138   : > { %821 = vmatprep.mubr.f32.mxu1 %v1606_v0 }
 0x13b   : > { %1348 = vmatmul.mubr.msk.f32.gmra.mxu1 %vm601_vm3, %v553_v25 }
 0x13c   : > { %827 = vmatprep.mubr.f32.mxu1 %v1606_v0 }
 0x13f   : > { %1349 = vmatmul.mubr.msk.f32.gmra.mxu1 %vm601_vm3, %v554_v26 }
 0x140   : > { %833 = vmatprep.mubr.f32.mxu1 %v1606_v0 }
 0x143   : > { %1350 = vmatmul.mubr.msk.f32.gmra.mxu1 %vm601_vm3, %v555_v28 }
 0x144   : > { %839 = vmatprep.mubr.f32.mxu1 %v1606_v0 }
 0x147   : > { %1351 = vmatmul.mubr.msk.f32.gmra.mxu1 %vm601_vm3, %v556_v30 }
 0x148   : > { %845 = vmatprep.mubr.f32.mxu1 %v1606_v0 }
 0x14b   : > { %1352 = vmatmul.mubr.msk.f32.gmra.mxu1 %vm601_vm3, %v557_v32 }
 0x14c   : > { %851 = vmatprep.mubr.f32.mxu1 %v1606_v0 }
 0x14f   : > { %1353 = vmatmul.mubr.msk.f32.gmra.mxu1 %vm601_vm3, %v558_v34 }
 0x150   : > { %857 = vmatprep.mubr.f32.mxu1 %v1606_v0 }
 0x153   : > { %1354 = vmatmul.mubr.msk.f32.gmra.mxu1 %vm601_vm3, %v559_v36 }
 0x154   : > { %863 = vmatprep.mubr.f32.mxu1 %v1606_v0 }
 0x157   : > { %1355 = vmatmul.mubr.msk.f32.gmra.mxu1 %vm601_vm3, %v576_v27 }
 0x158   : > { %869 = vmatprep.mubr.f32.mxu1 %v1606_v0 }
 0x15b   : > { %1356 = vmatmul.mubr.msk.f32.gmra.mxu1 %vm601_vm3, %v577_v29 }
 0x15c   : > { %875 = vmatprep.mubr.f32.mxu1 %v1606_v0 }
 0x15f   : > { %1357 = vmatmul.mubr.msk.f32.gmra.mxu1 %vm601_vm3, %v578_v31 }
 0x160   : > { %881 = vmatprep.mubr.f32.mxu1 %v1606_v0 }
 0x163   : > { %1358 = vmatmul.mubr.msk.f32.gmra.mxu1 %vm601_vm3, %v579_v33 }
 0x164   : > { %887 = vmatprep.mubr.f32.mxu1 %v1606_v0 }
 0x167   : > { %1359 = vmatmul.mubr.msk.f32.gmra.mxu1 %vm601_vm3, %v580_v35 }
 0x168   : > { %893 = vmatprep.mubr.f32.mxu1 %v1606_v0 }
 0x16b   : > { %1360 = vmatmul.mubr.msk.f32.gmra.mxu1 %vm601_vm3, %v581_v37 }
 0x16c   : > { %899 = vmatprep.mubr.f32.mxu1 %v1606_v0 }
 0x16f   : > { %1361 = vmatmul.mubr.msk.f32.gmra.mxu1 %vm601_vm3, %v582_v38 }
 0x170   : > { %905 = vmatprep.mubr.f32.mxu1 %v1606_v0 }
 0x173   : > { %1362 = vmatmul.mubr.msk.f32.gmra.mxu1 %vm601_vm3, %v583_v39 }
 0x174   : > { %911 = vmatprep.mubr.f32.mxu1 %v1606_v0 }
 0x177   : > { %1363 = vmatmul.mubr.msk.f32.gmra.mxu1 %vm601_vm3, %v584_v40 }
 0x178   : > { %917 = vmatprep.mubr.f32.mxu1 %v1606_v0 }
 0x17b   : > { %1364 = vmatmul.mubr.msk.f32.gmra.mxu1 %vm601_vm3, %v585_v41 }
 0x17c   : > { %923 = vmatprep.mubr.f32.mxu1 %v1606_v0 }
 0x17f   : > { %1365 = vmatmul.mubr.msk.f32.gmra.mxu1 %vm601_vm3, %v586_v42 }
 0x180   : > { %929 = vmatprep.mubr.f32.mxu1 %v1606_v0 }
 0x183   : > { %1366 = vmatmul.mubr.msk.f32.gmra.mxu1 %vm601_vm3, %v587_v43 }
 0x184   : > { %935 = vmatprep.mubr.f32.mxu1 %v1606_v0 }
 0x187   : > { %1367 = vmatmul.mubr.msk.f32.gmra.mxu1 %vm601_vm3, %v588_v44 }
 0x188   : > { %941 = vmatprep.mubr.f32.mxu1 %v1606_v0 }
 0x18b   : > { %1368 = vmatmul.mubr.msk.f32.gmra.mxu1 %vm601_vm3, %v589_v45 }
 0x18c   : > { %947 = vmatprep.mubr.f32.mxu1 %v1606_v0 }
 0x18f   : > { %1369 = vmatmul.mubr.msk.f32.gmra.mxu1 %vm601_vm3, %v590_v46 }
 0x190   : > { %953 = vmatprep.mubr.f32.mxu1 %v1606_v0 }
 0x193   : > { %1370 = vmatmul.mubr.msk.f32.gmra.mxu1 %vm601_vm3, %v591_v47 }
 0x1d7   : > { %v1862_v48 = vpop.f32.mrf.mxu1 }
 0x1d9   : > { %v1864_v49 = vpop.f32.mrf.mxu1 }
 0x1db   : > { %v1866_v50 = vpop.f32.mrf.mxu1 }
 0x1dd   : > { %v1868_v51 = vpop.f32.mrf.mxu1 }
 0x1df   : > { %v1870_v52 = vpop.f32.mrf.mxu1 }
 0x1e1   : > { %v1872_v53 = vpop.f32.mrf.mxu1 }
 0x1e3   : > { %v1874_v54 = vpop.f32.mrf.mxu1 }
 0x1e5   : > { %v1876_v55 = vpop.f32.mrf.mxu1 }
 0x1e7   : > { %v793_v56 = vpop.f32.mrf.mxu1 }
 0x1e9   : > { %v795_v57 = vpop.f32.mrf.mxu1 }
 0x1eb   : > { %v799_v58 = vpop.f32.mrf.mxu1 }
 0x1ed   : > { %v801_v59 = vpop.f32.mrf.mxu1 }
 0x1ef   : > { %v805_v60 = vpop.f32.mrf.mxu1 }
 0x1f1   : > { %v807_v61 = vpop.f32.mrf.mxu1 }
 0x1f3   : > { %v811_v63 = vpop.f32.mrf.mxu1 }
 0x1f5   : > { %v813_v3 = vpop.f32.mrf.mxu1 }
 0x1f7   : > { %v817_v5 = vpop.f32.mrf.mxu1 }
 0x1f9   : > { %v819_v6 = vpop.f32.mrf.mxu1 }
 0x1fb   : > { %v823_v7 = vpop.f32.mrf.mxu1 }
 0x1fd   : > { %v825_v8 = vpop.f32.mrf.mxu1 }
 0x1ff   : > { %v829_v9 = vpop.f32.mrf.mxu1 }
 0x201   : > { %v831_v10 = vpop.f32.mrf.mxu1 }
 0x203   : > { %v835_v11 = vpop.f32.mrf.mxu1 }
 0x205   : > { %v837_v12 = vpop.f32.mrf.mxu1 }
 0x207   : > { %v841_v13 = vpop.f32.mrf.mxu1 }
 0x209   : > { %v843_v14 = vpop.f32.mrf.mxu1 }
 0x20b   : > { %v847_v15 = vpop.f32.mrf.mxu1 }
 0x20d   : > { %v849_v16 = vpop.f32.mrf.mxu1 }
 0x20f   : > { %v853_v17 = vpop.f32.mrf.mxu1 }
 0x211   : > { %v855_v18 = vpop.f32.mrf.mxu1 }
 0x213   : > { %v859_v19 = vpop.f32.mrf.mxu1 }
 0x215   : > { %v861_v20 = vpop.f32.mrf.mxu1 }
 0x216   : > { %972 = vmatprep.subr.mxu0 %v861_v20 }
 0x217   : > { %v1887_v21 = vpop.f32.mrf.mxu1  ;;  %973 = vmatpush1.msra.mxu0 %v859_v19 }
 0x218   : > { %974 = vmatprep.subr.mxu0 %v855_v18 }
 0x219   : > { %v1889_v22 = vpop.f32.mrf.mxu1  ;;  %975 = vmatpush1.msra.mxu0 %v853_v17 }
 0x21a   : > { %976 = vmatprep.subr.mxu0 %v849_v16 }
 0x21b   : > { %v1891_v23 = vpop.f32.mrf.mxu1  ;;  %977 = vmatpush1.msra.mxu0 %v847_v15 }
 0x21c   : > { %978 = vmatprep.subr.mxu0 %v843_v14 }
 0x21d   : > { %v1893_v24 = vpop.f32.mrf.mxu1  ;;  %979 = vmatpush1.msra.mxu0 %v841_v13 }
 0x21e   : > { %980 = vmatprep.subr.mxu0 %v837_v12 }
 0x21f   : > { %v1895_v25 = vpop.f32.mrf.mxu1  ;;  %981 = vmatpush1.msra.mxu0 %v835_v11 }
 0x220   : > { %982 = vmatprep.subr.mxu0 %v831_v10 }
 0x221   : > { %v1897_v26 = vpop.f32.mrf.mxu1  ;;  %983 = vmatpush1.msra.mxu0 %v829_v9 }
 0x222   : > { %984 = vmatprep.subr.mxu0 %v825_v8 }
 0x223   : > { %v1899_v27 = vpop.f32.mrf.mxu1  ;;  %985 = vmatpush1.msra.mxu0 %v823_v7 }
 0x224   : > { %986 = vmatprep.subr.mxu0 %v819_v6  ;;  %v1059_v6 = vld [vmem:[%s1979_s5] sm:$0xf] }
 0x225   : > { %v1901_v28 = vpop.f32.mrf.mxu1  ;;  %987 = vmatpush1.msra.mxu0 %v817_v5 }
 0x226   : > { %988 = vmatprep.subr.mxu0 %v813_v3 }
 0x227   : > { %v889_v29 = vpop.f32.mrf.mxu1  ;;  %989 = vmatpush1.msra.mxu0 %v811_v63 }
 0x228   : > { %990 = vmatprep.subr.mxu0 %v807_v61 }
 0x229   : > { %v891_v30 = vpop.f32.mrf.mxu1  ;;  %991 = vmatpush1.msra.mxu0 %v805_v60 }
 0x22a   : > { %992 = vmatprep.subr.mxu0 %v801_v59 }
 0x22b   : > { %v895_v31 = vpop.f32.mrf.mxu1  ;;  %993 = vmatpush1.msra.mxu0 %v799_v58 }
 0x22c   : > { %994 = vmatprep.subr.mxu0 %v795_v57 }
 0x22d   : > { %v897_v32 = vpop.f32.mrf.mxu1  ;;  %995 = vmatpush1.msra.mxu0 %v793_v56  ;;  %v1049_v56 = vlaneseq }
 0x22e   : > { %996 = vmatprep.subr.mxu0 %v1876_v55 }
 0x22f   : > { %v901_v33 = vpop.f32.mrf.mxu1  ;;  %997 = vmatpush1.msra.mxu0 %v1874_v54  ;;  %v1050_v58 = vshrl.u32 %v1049_v56, 7 }
 0x230   : > { %998 = vmatprep.subr.mxu0 %v1872_v53 }
 0x231   : > { %v903_v34 = vpop.f32.mrf.mxu1  ;;  %999 = vmatpush1.msra.mxu0 %v1870_v52 }
 0x232   : > { %1000 = vmatprep.subr.mxu0 %v1868_v51 }
 0x233   : > { %v907_v35 = vpop.f32.mrf.mxu1  ;;  %1001 = vmatpush1.msra.mxu0 %v1866_v50 }
 0x234   : > { %1002 = vmatprep.subr.mxu0 %v1864_v49  ;;  %v1608_v49 = vmov 1983009808  }
 0x235   : > { %v909_v36 = vpop.f32.mrf.mxu1  ;;  %1003 = vmatpush1.msra.mxu0 %v1862_v48  ;;  %v1061_v48 = vld [vmem:[%s1980_s6] sm:$0xf]  ;;  %v1047_v55 = vunpack.c.l.s4 %v1608_v49 }
 0x236   : > { %1064 = vperm.xlu1 %1462, %v1061_v48  }
 0x237   : > { %v913_v37 = vpop.f32.mrf.mxu1  ;;  %v1048_v57 = vunpack.c.0.s8 %v1047_v55 }
 0x239   : > { %v915_v38 = vpop.f32.mrf.mxu1  ;;  %v1051_v60 = vsub.s32 %v1048_v57, %v1050_v58 }
 0x23b   : > { %v919_v39 = vpop.f32.mrf.mxu1 }
 0x23d   : > { %v921_v40 = vpop.f32.mrf.mxu1 }
 0x23f   : > { %v925_v41 = vpop.f32.mrf.mxu1 }
 0x241   : > { %v927_v42 = vpop.f32.mrf.mxu1 }
 0x243   : > { %v931_v43 = vpop.f32.mrf.mxu1 }
 0x245   : > { %v933_v44 = vpop.f32.mrf.mxu1 }
 0x247   : > { %v937_v45 = vpop.f32.mrf.mxu1 }
 0x249   : > { %v939_v46 = vpop.f32.mrf.mxu1 }
 0x24b   : > { %v943_v47 = vpop.f32.mrf.mxu1 }
 0x24d   : > { %v945_v51 = vpop.f32.mrf.mxu1 }
 0x24f   : > { %v949_v52 = vpop.f32.mrf.mxu1 }
 0x251   : > { %v951_v53 = vpop.f32.mrf.mxu1 }
 0x253   : > { %v955_v50 = vpop.f32.mrf.mxu1 }
 0x255   : > { %v957_v54 = vpop.f32.mrf.mxu1 }
 0x256   : > { %1004 = vmatprep.subr.mxu0 %v957_v54 }
 0x257   : > { %1005 = vmatpush2.msra.mxu0 %v955_v50 }
 0x258   : > { %1006 = vmatprep.subr.mxu0 %v951_v53 }
 0x259   : > { %1007 = vmatpush2.msra.mxu0 %v949_v52 }
 0x25a   : > { %1008 = vmatprep.subr.mxu0 %v945_v51 }
 0x25b   : > { %1009 = vmatpush2.msra.mxu0 %v943_v47 }
 0x25c   : > { %1010 = vmatprep.subr.mxu0 %v939_v46 }
 0x25d   : > { %1011 = vmatpush2.msra.mxu0 %v937_v45 }
 0x25e   : > { %1012 = vmatprep.subr.mxu0 %v933_v44 }
 0x25f   : > { %1013 = vmatpush2.msra.mxu0 %v931_v43 }
 0x260   : > { %1014 = vmatprep.subr.mxu0 %v927_v42 }
 0x261   : > { %1015 = vmatpush2.msra.mxu0 %v925_v41 }
 0x262   : > { %1016 = vmatprep.subr.mxu0 %v921_v40 }
 0x263   : > { %1017 = vmatpush2.msra.mxu0 %v919_v39 }
 0x264   : > { %1018 = vmatprep.subr.mxu0 %v915_v38 }
 0x265   : > { %1019 = vmatpush2.msra.mxu0 %v913_v37 }
 0x266   : > { %1020 = vmatprep.subr.mxu0 %v909_v36 }
 0x267   : > { %1021 = vmatpush2.msra.mxu0 %v907_v35 }
 0x268   : > { %1022 = vmatprep.subr.mxu0 %v903_v34 }
 0x269   : > { %1023 = vmatpush2.msra.mxu0 %v901_v33 }
 0x26a   : > { %1024 = vmatprep.subr.mxu0 %v897_v32 }
 0x26b   : > { %1025 = vmatpush2.msra.mxu0 %v895_v31 }
 0x26c   : > { %1026 = vmatprep.subr.mxu0 %v891_v30 }
 0x26d   : > { %1027 = vmatpush2.msra.mxu0 %v889_v29 }
 0x26e   : > { %1028 = vmatprep.subr.mxu0 %v1901_v28 }
 0x26f   : > { %1029 = vmatpush2.msra.mxu0 %v1899_v27 }
 0x270   : > { %1030 = vmatprep.subr.mxu0 %v1897_v26 }
 0x271   : > { %1031 = vmatpush2.msra.mxu0 %v1895_v25 }
 0x272   : > { %1032 = vmatprep.subr.mxu0 %v1893_v24 }
 0x273   : > { %1033 = vmatpush2.msra.mxu0 %v1891_v23 }
 0x274   : > { %1034 = vmatprep.subr.mxu0 %v1889_v22 }
 0x275   : > { %1035 = vmatpush2.msra.mxu0 %v1887_v21 }
 0x276   : > { %1037 = vmatmul.mubr.f32.vlgmr.msra.gmra.mxu0 %v1883_v62 }
 0x277   : > { %1147 = vmatprep.mubr.f32.mxu0 %v1606_v0 }
 0x2b1   : > { %v1065_v7 = vpop.permute.xlu1 %1064 }
 0x336   : > { %v1038_v59 = vpop.f32.mrf.mxu0 }
 0x338   : > { %v1040_v61 = vpop.f32.mrf.mxu0 }
 0x339   : > { %v1045_v63 = vcombine.low %v1038_v59, %v1040_v61 }
 0x33b   : > { %v1052_v62 = vrot.slane %v1045_v63, %v1051_v60 }
 0x33d   : > { %v1054_v3 = vadd.f32 %v1052_v62, %v960_v1 }
 0x33f   : > { %1055 = vst [vmem:[#allocation3] sm:$0xf] %v1054_v3 }
 0x346   : > { %v1372_v0 = vld.sshfl [vmem:[#allocation3] sm:$0x33 pattern:$0x76325410] }
 0x347   : > { %v1075_v5 = vcombine.high %v1372_v0, %v1372_v0 }
 0x349   : > { %1373 = vmatprep.subr.msk.mxu0 %vm698_vm2, %v1075_v5 }
 0x34a   : > { %1374 = vmatpush1.msk.msra.mxu0 %vm698_vm2, %v1372_v0 }
 0x34b   : > { %1375 = vmatmul.mubr.msk.f32.vlgmr.msra.gmra.mxu0 %vm601_vm3, %v1059_v6 }
 0x40b   : > { %v1149_v8 = vpop.f32.mrf.mxu0 }
 0x40c   : > { %v1150_v9 = vadd.f32 %v1149_v8, %v1065_v7 }
 0x40d   : > { %v1151_v10 = vpop.f32.mrf.mxu0 }
 0x40e   : > { %v1152_v11 = vadd.f32 %v1151_v10, %v1065_v7  ;;  %v1158_v12 = vadd.f32 %v1150_v9, %v1786_v2 }
 0x410   : > { %v1159_v13 = vadd.f32 %v1152_v11, %v1793_v4 }
 0x412   : > { %v1162_v14 = vcombine.low %v1158_v12, %v1159_v13 }
 0x414   : > { %1164 = vst [vmem:[%s384_s11] sm:$0xff] %v1162_v14 }
 0x415   : > { %1531 = shalt.err (!%p1528_p5)
}
 0x416   : > { %s1532_s10 = scalar_lea.hbm %s1180_s19, 128  ;;  %s1536_s15 = scalar_lea.hbm %s1981_s7, 256 }
 0x417   : > { %p1533_p7 = scmp.ne.s32.totalorder %s1180_s19, %s1532_s10  ;;  %p1537_p10 = scmp.lt.s32.totalorder %s1180_s19, %s1981_s7 }
 0x418   : > { %p1538_p9 = scmp.lt.s32.totalorder %s1536_s15, %s1532_s10 }
 0x419   : > { %p1534_p6 = pnand %p1533_p7, %p1736_p0 }
 0x41a   : > { %p1539_p8 = por %p1538_p9, %p1537_p10 }
 0x41b   : > { %p1535_p4 = pneg %p1534_p6 }
 0x41d   : > { %p1540_p1 = pnand %p1539_p8, %p1535_p4 }
 0x41f   : > { %1543 = shalt.err (!%p1540_p1)
}
 0x420   : > { %1391 = dma.vmem_to_hbm [thread:$0]  (%p1736_p0), %s1183_s9, 128, %s1180_s19, %s1166_s20  }
 0x421 PF: > { %s1194_s3 = sand.u32 1, %s1582_s24   ;;  %p1998_p13 = scmp.ne.s32.totalorder %s1990_s12, 0 }
 0x422   : > { %p1999_p11 = scmp.ge.s32.totalorder %s1602_s29, 2  ;;  %s1195_s11 = scalar_lea.sflag [#allocation6], %s1194_s3 }
 0x424   : > { %p1402_p2 = pnand %p1999_p11, %p1998_p13 }
 0x426   : > { %p1403_p12 = pneg %p1402_p2 }
 0x428   : > { %1577 = dma.done.wait (%p1403_p12), %s1195_s11, 128  }
 0x429   : > { %1579 = vsyncadd (%p1403_p12), %s1195_s11, 4294967168  ;;  %s24_s29 = sadd.s32 1, %s1602_s29   ;;  %s2000_s27 = sld [smem:[#allocation13_spill]] }
 0x42a   : > { %p21_p3 = scmp.ge.s32.totalorder %s24_s29, 4   ;;  %s2001_s28 = sld [smem:[#allocation14_spill]] }
 0x42b   : > { %s2002_s24 = smov %s1586_s25  ;;  %s2003_s25 = smov %s1590_s26 }
 0x42c   : > { %s2004_s26 = smov %s1742_s8  ;;  %23 = sbr.rel (!%p21_p3) target bundleno = 9 (0x9), region = 111 }
 0x431   :  { %1200 = vsyncpa [#allocation5], 1 }
 0x432   :  { %1202 = vsyncpa [#allocation5 + $0x1], 1 }
 0x433   :  { %1203 = vsyncpa [#allocation8], 1 }
 0x434   :  { %1204 = vsyncpa [#allocation6], 1 }
 0x435   :  { %1206 = vsyncpa [#allocation6 + $0x1], 1 }

</bundles_post_ra>
